<compile_context>
chip_gen: v7x
topology: tpu7x:2x2x1
jax: 0.10.0
libtpu: 0.0.40
codegen_flags: <defaults>
</compile_context>

<pallas_src>
import numpy as np
import jax
import jax.numpy as jnp
from jax.experimental import pallas as pl
from jax.experimental.pallas import tpu as pltpu


# ---------------------------------------------------------------------------
# Options (mirrors the PyTorch `opt` namespace fields used by Add_CFO)
# ---------------------------------------------------------------------------
class Opt:
    def __init__(self, *, S, M, K, N_pilot, is_trick, is_cfo_random, max_ang, ang):
        self.S = S
        self.M = M
        self.K = K
        self.N_pilot = N_pilot
        self.is_trick = is_trick
        self.is_cfo_random = is_cfo_random
        self.max_ang = max_ang
        self.ang = ang


# ---------------------------------------------------------------------------
# Pallas kernel: fused phase generation + complex rotation
# ---------------------------------------------------------------------------
def _cfo_kernel(x_ref, ang_ref, idx_ref, o_ref):
    """Rotate [real; imag] rows by exp(j * ang * idx * 2*pi/360).

    x_ref, o_ref : (2, B, Tpad)  row 0 = real, row 1 = imag, lanes = time samples
    ang_ref      : (B, 1)        CFO angle (degrees/sample) per stream row
    idx_ref      : (1, Tpad)     per-sample phase index (is_trick resolved on host)
    """
    deg = ang_ref[...] * idx_ref[...]                    # (B, Tpad), degrees
    phase = deg * jnp.float32(2.0 * np.pi / 360.0)       # radians
    c = jnp.cos(phase)                                   # EUP
    s = jnp.sin(phase)                                   # EUP
    xr = x_ref[0]                                        # (B, Tpad)
    xi = x_ref[1]
    o_ref[0] = c * xr - s * xi
    o_ref[1] = c * xi + s * xr


# ---------------------------------------------------------------------------
# Wrappers (layout plumbing only — all math happens in the kernel)
# ---------------------------------------------------------------------------
def add_cfo_apply(opt, x, angs):
    """x: (N, P, S+1, M+N_pilot+K, 2) float, angs: (N,) degrees/sample."""
    N, P, S1, L, two = x.shape
    assert two == 2
    T = S1 * L
    Tpad = ((T + 127) // 128) * 128
    B = N * P

    # per-sample phase index, flattened over (symbol, sample); compile-time constant
    if opt.is_trick:
        idx = np.tile(np.arange(-opt.K, opt.M + opt.N_pilot, dtype=np.float32), S1)
    else:
        idx = np.arange(0, T, dtype=np.float32)
    idx_row = np.zeros((1, Tpad), np.float32)
    idx_row[0, :T] = idx

    # lane-dense layout: (re/im, N*P, time) with time padded to a multiple of 128
    x2 = jnp.moveaxis(x.astype(jnp.float32).reshape(N, P, T, 2), -1, 0)
    x2 = x2.reshape(2, B, T)
    x2 = jnp.pad(x2, ((0, 0), (0, 0), (0, Tpad - T)))
    ang_col = jnp.repeat(angs.astype(jnp.float32), P).reshape(B, 1)

    out = pl.pallas_call(
        _cfo_kernel,
        out_shape=jax.ShapeDtypeStruct((2, B, Tpad), jnp.float32),
        in_specs=[pl.BlockSpec(memory_space=pltpu.MemorySpace.VMEM)] * 3,
        out_specs=pl.BlockSpec(memory_space=pltpu.MemorySpace.VMEM),
    )(x2, ang_col, jnp.asarray(idx_row))

    out = out[:, :, :T].reshape(2, N, P, S1, L)
    return jnp.moveaxis(out, 0, -1)                      # (N, P, S1, L, 2)


def add_cfo_forward(opt, x, key):
    """Full module forward: draw the CFO angles, then rotate."""
    N = x.shape[0]
    # TODO(synk): torch.rand angle draw is kept host-side with jax.random (N scalars);
    # too small to justify in-kernel pltpu PRNG.
    if opt.is_cfo_random:
        angs = (jax.random.uniform(key, (N,), jnp.float32) * 2.0 - 1.0) * opt.max_ang
    else:
        angs = jnp.full((N,), opt.ang, jnp.float32)
    return add_cfo_apply(opt, x, angs)


# ---------------------------------------------------------------------------
# Pure-JAX reference (mirror of the PyTorch module) for validation
# ---------------------------------------------------------------------------
def add_cfo_reference(opt, x, angs):
    N, P, S1, L, _ = x.shape
    if opt.is_trick:
        index = jnp.arange(-opt.K, opt.M + opt.N_pilot, dtype=jnp.float32)
        angs_all = jnp.tile(angs[:, None] * index[None, :], (1, S1)).reshape(N, S1, L)
    else:
        index = jnp.arange(0, S1 * L, dtype=jnp.float32)
        angs_all = (angs[:, None] * index[None, :]).reshape(N, S1, L)
    real = jnp.cos(angs_all / 360.0 * 2.0 * np.pi)[:, None, :, :, None]
    imag = jnp.sin(angs_all / 360.0 * 2.0 * np.pi)[:, None, :, :, None]
    real_in = x[..., 0:1]
    imag_in = x[..., 1:2]
    real_out = real * real_in - imag * imag_in
    imag_out = real * imag_in + imag * real_in
    return jnp.concatenate([real_out, imag_out], axis=4)


# ---------------------------------------------------------------------------
if __name__ == "__main__":
    key = jax.random.PRNGKey(0)
    k_x, k_ang = jax.random.split(key)

    N, P = 2, 2
    base = dict(S=4, M=16, K=4, N_pilot=1, max_ang=1.7, ang=0.5)
    S1 = base["S"] + 1
    L = base["M"] + base["N_pilot"] + base["K"]

    x = jax.random.normal(k_x, (N, P, S1, L, 2), jnp.float32)

    configs = [
        Opt(is_trick=True, is_cfo_random=True, **base),
        Opt(is_trick=False, is_cfo_random=False, **base),
    ]

    for opt in configs:
        if opt.is_cfo_random:
            angs = (jax.random.uniform(k_ang, (N,), jnp.float32) * 2.0 - 1.0) * opt.max_ang
        else:
            angs = jnp.full((N,), opt.ang, jnp.float32)

        out = jax.block_until_ready(add_cfo_apply(opt, x, angs))
        ref = jax.block_until_ready(add_cfo_reference(opt, x, angs))

        assert out.shape == (N, P, S1, L, 2)
        assert out.dtype == jnp.float32
        assert bool(jnp.all(jnp.isfinite(out)))
        max_err = float(jnp.max(jnp.abs(out - ref)))
        assert max_err < 1e-4, f"mismatch vs reference: {max_err}"

    # exercise the full forward (random-angle draw path) once as well
    _ = jax.block_until_ready(add_cfo_forward(configs[0], x, k_ang))

    print("KERNEL_OK")
</pallas_src>

<mosaic_0001>
module attributes {stable_mosaic.version = 11 : i64} {
  func.func @_cfo_kernel(%arg0: memref<2x4x128xf32, #tpu.memory_space<vmem>>, %arg1: memref<4x1xf32, #tpu.memory_space<vmem>>, %arg2: memref<1x128xf32, #tpu.memory_space<vmem>>, %arg3: memref<2x4x128xf32, #tpu.memory_space<vmem>>) attributes {dimension_semantics = [], scalar_prefetch = 0 : i64, scratch_operands = 0 : i64, tpu.core_type = #tpu.core_type<tc>} {
    %c0 = arith.constant 0 : index
    %c0_0 = arith.constant 0 : index
    %0 = vector.load %arg1[%c0, %c0_0] : memref<4x1xf32, #tpu.memory_space<vmem>>, vector<4x1xf32>
    %c0_1 = arith.constant 0 : index
    %c0_2 = arith.constant 0 : index
    %1 = vector.load %arg2[%c0_1, %c0_2] : memref<1x128xf32, #tpu.memory_space<vmem>>, vector<1x128xf32>
    %2 = vector.broadcast %0 : vector<4x1xf32> to vector<4x128xf32>
    %3 = vector.broadcast %1 : vector<1x128xf32> to vector<4x128xf32>
    %4 = arith.mulf %2, %3 : vector<4x128xf32>
    %cst = arith.constant 0.0174532924 : f32
    %5 = vector.broadcast %cst : f32 to vector<4x128xf32>
    %6 = arith.mulf %4, %5 : vector<4x128xf32>
    %7 = math.cos %6 : vector<4x128xf32>
    %8 = math.sin %6 : vector<4x128xf32>
    %c0_3 = arith.constant 0 : index
    %c0_4 = arith.constant 0 : index
    %c0_5 = arith.constant 0 : index
    %9 = vector.load %arg0[%c0_3, %c0_4, %c0_5] : memref<2x4x128xf32, #tpu.memory_space<vmem>>, vector<1x4x128xf32>
    %10 = vector.shape_cast %9 : vector<1x4x128xf32> to vector<4x128xf32>
    %c1 = arith.constant 1 : index
    %c0_6 = arith.constant 0 : index
    %c0_7 = arith.constant 0 : index
    %11 = vector.load %arg0[%c1, %c0_6, %c0_7] : memref<2x4x128xf32, #tpu.memory_space<vmem>>, vector<1x4x128xf32>
    %12 = vector.shape_cast %11 : vector<1x4x128xf32> to vector<4x128xf32>
    %13 = arith.mulf %7, %10 : vector<4x128xf32>
    %14 = arith.mulf %8, %12 : vector<4x128xf32>
    %15 = arith.subf %13, %14 : vector<4x128xf32>
    %c0_8 = arith.constant 0 : index
    %c0_9 = arith.constant 0 : index
    %c0_10 = arith.constant 0 : index
    %16 = vector.load %arg3[%c0_8, %c0_9, %c0_10] : memref<2x4x128xf32, #tpu.memory_space<vmem>>, vector<1x4x128xf32>
    %17 = vector.shape_cast %16 : vector<1x4x128xf32> to vector<4x128xf32>
    %18 = vector.shape_cast %15 : vector<4x128xf32> to vector<1x4x128xf32>
    tpu.vector_store %arg3[%c0_8, %c0_9, %c0_10], %18 {strides = array<i32>} : memref<2x4x128xf32, #tpu.memory_space<vmem>>, vector<1x4x128xf32>,
    %19 = arith.mulf %7, %12 : vector<4x128xf32>
    %20 = arith.mulf %8, %10 : vector<4x128xf32>
    %21 = arith.addf %19, %20 : vector<4x128xf32>
    %c1_11 = arith.constant 1 : index
    %c0_12 = arith.constant 0 : index
    %c0_13 = arith.constant 0 : index
    %22 = vector.load %arg3[%c1_11, %c0_12, %c0_13] : memref<2x4x128xf32, #tpu.memory_space<vmem>>, vector<1x4x128xf32>
    %23 = vector.shape_cast %22 : vector<1x4x128xf32> to vector<4x128xf32>
    %24 = vector.shape_cast %21 : vector<4x128xf32> to vector<1x4x128xf32>
    tpu.vector_store %arg3[%c1_11, %c0_12, %c0_13], %24 {strides = array<i32>} : memref<2x4x128xf32, #tpu.memory_space<vmem>>, vector<1x4x128xf32>,
    return
  }
}

</mosaic_0001>

<bundles_post_ra>
// kernel: tpu_custom_call.1
= control target key start
LH: loop header
LB: loop body
LE: loop exit
PB: predicated region body
PF: predicated region fallthrough
CT: control target
= control target key end

     0   :  { %8 = vsyncpa [#allocation3], 0  ;;  %s445_s0 = inlined_call_operand.hbm [shape: f32[2,4,128], index: 0, kind: input, shape index: {}]   ;;  %s446_s1 = inlined_call_operand.vmem [shape: f32[4,1], index: 1, kind: input, shape index: {}]   ;;  %s447_s2 = inlined_call_operand.vmem [shape: f32[1,128], index: 2, kind: input, shape index: {}]   ;;  %s448_s3 = inlined_call_operand.hbm [shape: f32[2,4,128], index: 3, kind: output, shape index: {}]  }
   0x1   :  { %9 = vsyncpa [#allocation4], 0  ;;  %s357_s12 = smov [#allocation2]   ;;  %s309_s16 = scalar_lea.hbm %s445_s0, 128 }
   0x2   :  { %s15_s13 = sshll.u32 %s357_s12, 4  ;;  %p310_p0 = scmp.ne.s32.totalorder %s445_s0, %s309_s16  ;;  %s16_s13 = int_to_ptr.vmem [resolvable:$true] %s15_s13 }
   0x3   :  { %p313_p1 = scmp.lt.u32.totalorder %s309_s16, %s445_s0 }
   0x5   :  { %p315_p2 = pnand %p313_p1, %p310_p0 }
   0x7   :  { %318 = shalt.err (!%p315_p2)
}
   0x8   :  { %s319_s21 = scalar_lea.vmem %s16_s13, 128  ;;  %p324_p4 = scmp.lt.s32.totalorder %s16_s13, %s16_s13 }
   0x9   :  { %p320_p3 = scmp.ne.s32.totalorder %s16_s13, %s319_s21  ;;  %p325_p5 = scmp.lt.s32.totalorder %s319_s21, %s319_s21 }
   0xb   :  { %p326_p6 = por %p325_p5, %p324_p4 }
   0xd   :  { %p327_p7 = pnand %p326_p6, %p320_p3 }
   0xf   :  { %330 = shalt.err (!%p327_p7)
}
  0x10   :  { %s358_s22 = smov 64   ;;  %s359_s23 = smov 4  }
  0x11   :  { %21 = dma.hbm_to_vmem [thread:$0]  %s445_s0, 128, %s16_s13, [#allocation3], %s358_s22, %s358_s22, %s359_s23  }
  0x12   :  { %353 = dma.done.wait [#allocation3], 128  }
  0x13   :  { %354 = vsyncadd [#allocation3], 4294967168  ;;  %v360_v0 = vmov 0   ;;  %v29_v1 = vld [vmem:[%s446_s1] sm:$0xf]  ;;  %s367_s0 = smov [#allocation5]  }
  0x14   :  { %304 = vset.pattern.permute.xlu0 %v360_v0  ;;  %v280_v2 = vld [vmem:[%s447_s2] ss:$0 sm:$0xff]  ;;  %v361_v16 = vmov 683565275   ;;  %v362_v18 = vmov 2475754826  }
  0x15   :  { %33 = vperm.xlu0 %304, %v29_v1   ;;  %v363_v21 = vmov 2131351028   ;;  %v364_v24 = vmov 2102212464   ;;  %v365_v27 = vmov 920167782  }
  0x16   :  { %v366_v30 = vmov 1326507024   ;;  %s268_s1 = sshll.u32 %s367_s0, 4  ;;  %s269_s1 = int_to_ptr.vmem [resolvable:$true] %s268_s1 }
  0x17   :  { %s331_s2 = scalar_lea.vmem %s269_s1, 128  ;;  %p336_p9 = scmp.lt.s32.totalorder %s269_s1, %s269_s1 }
  0x18   :  { %p332_p8 = scmp.ne.s32.totalorder %s269_s1, %s331_s2  ;;  %p337_p10 = scmp.lt.s32.totalorder %s331_s2, %s331_s2 }
  0x1a   :  { %p338_p11 = por %p337_p10, %p336_p9 }
  0x1c   :  { %p339_p12 = pnand %p338_p11, %p332_p8 }
  0x94   :  { %v34_v3 = vpop.permute.xlu0 %33 }
  0x95   :  { %v42_v4 = vmul.f32 %v280_v2, %v34_v3 }
  0x97   :  { %v409_v5 = vmul.f32 0.017453292, %v42_v4 }
  0x99   :  { %v47_v6 = vand.u32 2139095040, %v409_v5  ;;  %v44_v10 = vand.u32 2147483647, %v409_v5  ;;  %vm46_vm7 = vcmp.lt.s32.totalorder %v409_v5, 0  ;;  %vm136_vm15 = vweird.f32 %v409_v5 }
  0x9b   :  { %v48_v7 = vshrl.u32 %v47_v6, 23  ;;  %v51_v13 = vand.u32 8388607, %v44_v10  ;;  %vm45_vm8 = vcmp.le.f32.partialorder %v44_v10, 0.7853982 }
  0x9d   :  { %v281_v8 = vadd.s32 4294967169, %v48_v7  ;;  %v52_v32 = vor.u32 8388608, %v51_v13 }
  0x9f   :  { %v54_v9 = vadd.s32 1, %v281_v8  ;;  %v92_v46 = vshll.u32 %v52_v32, 8 }
  0xa1   :  { %vm55_vm0 = vcmp.gt.s32.totalorder %v54_v9, 0 }
  0xa2   :  { %v56_v11 = vsel %vm55_vm0, %v54_v9, 0 }
  0xa3   :  { %v58_v12 = vand.u32 31, %v56_v11  ;;  %v57_v15 = vshrl.u32 %v56_v11, 5 }
  0xa5   :  { %v59_v14 = vsub.s32 32, %v58_v12  ;;  %v61_v17 = vshll.u32 %v361_v16, %v58_v12  ;;  %v64_v19 = vshll.u32 %v362_v18, %v58_v12  ;;  %v67_v23 = vshll.u32 %v363_v21, %v58_v12 }
  0xa6   :  { %v70_v26 = vshll.u32 %v364_v24, %v58_v12  ;;  %v73_v29 = vshll.u32 %v365_v27, %v58_v12  ;;  %vm76_vm1 = vcmp.lt.s32.totalorder %v57_v15, 1  ;;  %vm79_vm2 = vcmp.lt.s32.totalorder %v57_v15, 4 }
  0xa7   :  { %v62_v20 = vshrl.u32 %v362_v18, %v59_v14  ;;  %v65_v22 = vshrl.u32 %v363_v21, %v59_v14  ;;  %v68_v25 = vshrl.u32 %v364_v24, %v59_v14  ;;  %v71_v28 = vshrl.u32 %v365_v27, %v59_v14 }
  0xa8   :  { %v74_v31 = vshrl.u32 %v366_v30, %v59_v14  ;;  %v60_v41 = vshrl.u32 %v361_v16, %v59_v14  ;;  %vm78_vm3 = vcmp.lt.s32.totalorder %v57_v15, 3  ;;  %vm77_vm4 = vcmp.lt.s32.totalorder %v57_v15, 2 }
  0xa9   :  { %v63_v33 = vor.u32 %v62_v20, %v61_v17  ;;  %v66_v34 = vor.u32 %v65_v22, %v64_v19  ;;  %v69_v35 = vor.u32 %v68_v25, %v67_v23  ;;  %v72_v36 = vor.u32 %v71_v28, %v70_v26 }
  0xaa   :  { %v75_v37 = vor.u32 %v74_v31, %v73_v29 }
  0xab   :  { %v81_v38 = vsel %vm79_vm2, %v69_v35, 2102212464  ;;  %v84_v39 = vsel %vm76_vm1, %v63_v33, %v66_v34  ;;  %v88_v40 = vsel %vm76_vm1, %v66_v34, %v69_v35  ;;  %v85_v42 = vsel %vm79_vm2, %v72_v36, 920167782 }
  0xac   :  { %v89_v43 = vsel %vm79_vm2, %v75_v37, 1326507024  ;;  %v86_v44 = vsel %vm78_vm3, %v69_v35, %v85_v42  ;;  %v80_v47 = vsel %vm76_vm1, %v60_v41, %v63_v33  ;;  %v82_v48 = vsel %vm78_vm3, %v66_v34, %v81_v38  ;;  %v251_v35 = vld [vmem:[#allocation2] sm:$0xf] }
  0xad   :  { %v90_v45 = vsel %vm78_vm3, %v72_v36, %v89_v43  ;;  %v87_v49 = vsel %vm77_vm4, %v84_v39, %v86_v44  ;;  %v83_v55 = vsel %vm77_vm4, %v80_v47, %v82_v48  ;;  %v253_v36 = vld [vmem:[#allocation2 + $0x4] sm:$0xf] }
  0xae   :  { %v91_v50 = vsel %vm77_vm4, %v88_v40, %v90_v45  ;;  %v418_v53 = vmul.u32.u64.low %v92_v46, %v87_v49  ;;  %v419_v54 = vmul.u32.u64.high %v92_v46, %v87_v49, %v418_v53  ;;  %v99_v57 = vmul.u32 %v92_v46, %v83_v55 }
  0xaf   :  { %v415_v51 = vmul.u32.u64.low %v92_v46, %v91_v50  ;;  %v416_v52 = vmul.u32.u64.high %v92_v46, %v91_v50, %v415_v51 }
  0xb0   :  { %v102_v56 = vadd.s32 1, %v419_v54 }
  0xb1   :  { %vm101_vm5 = vc.u32 %v416_v52, %v418_v53  ;;  %v100_v6 = vadd.s32 %v418_v53, %v416_v52 }
  0xb2   :  { %v103_v58 = vsel %vm101_vm5, %v102_v56, %v419_v54 }
  0xb3   :  { %v104_v59 = vadd.s32 %v103_v58, %v99_v57 }
  0xb5   :  { %v105_v60 = vadd.s32 536870912, %v104_v59 }
  0xb7   :  { %v106_v61 = vshrl.u32 %v105_v60, 30 }
  0xb9   :  { %v107_v62 = vshll.u32 %v106_v61, 30  ;;  %v130_v19 = vsub.s32 4, %v106_v61 }
  0xbb   :  { %v108_v63 = vsub.s32 %v104_v59, %v107_v62  ;;  %v131_v22 = vsel %vm46_vm7, %v130_v19, %v106_v61 }
  0xbc   :  { %v133_v24 = vsel %vm45_vm8, 0, %v131_v22 }
  0xbd   :  { %v110_v0 = vsub.s32 0, %v108_v63  ;;  %v240_v25 = vadd.s32 3, %v133_v24  ;;  %v137_v26 = vand.u32 3, %v133_v24 }
  0xbf   :  { %v282_v1 = vmin.u32 %v110_v0, %v108_v63  ;;  %v241_v27 = vand.u32 3, %v240_v25  ;;  %vm142_vm9 = vcmp.eq.s32.totalorder %v137_v26, 2  ;;  %vm139_vm11 = vcmp.eq.s32.totalorder %v137_v26, 0 }
  0xc0   :  { %vm138_vm13 = vcmp.lt.s32.totalorder %v137_v26, 2 }
  0xc1   :  { %v112_v2 = vclz %v282_v1  ;;  %vm246_vm10 = vcmp.eq.s32.totalorder %v241_v27, 2  ;;  %vm243_vm12 = vcmp.eq.s32.totalorder %v241_v27, 0  ;;  %vm242_vm14 = vcmp.lt.s32.totalorder %v241_v27, 2 }
  0xc3   :  { %v283_v3 = vadd.s32 4294967294, %v112_v2 }
  0xc5   :  { %vm284_vm6 = vcmp.lt.s32.totalorder %v283_v3, 0 }
  0xc6   :  { %v115_v4 = vsel %vm284_vm6, 0, %v283_v3 }
  0xc7   :  { %v116_v7 = vsub.s32 32, %v115_v4  ;;  %v120_v8 = vsub.s32 4294967266, %v115_v4  ;;  %v117_v9 = vshll.u32 %v108_v63, %v115_v4 }
  0xc9   :  { %v118_v11 = vshrl.u32 %v100_v6, %v116_v7  ;;  %v121_v12 = vadd.s32 127, %v120_v8 }
  0xcb   :  { %v119_v13 = vor.u32 %v118_v11, %v117_v9  ;;  %v122_v14 = vshll.u32 %v121_v12, 23 }
  0xcd   :  { %v123_v15 = vor.u32 4788187, %v122_v14  ;;  %v126_v17 = vcvt.s32.f32 %v119_v13 }
  0xcf   :  { %v124_v16 = vand.u32 2147483647, %v123_v15 }
  0xd1   :  { %v127_v18 = vmul.f32 %v126_v17, %v124_v16 }
  0xd3   :  { %v128_v20 = vxor.u32 2147483648, %v127_v18 }
  0xd5   :  { %v129_v21 = vsel %vm46_vm7, %v128_v20, %v127_v18 }
  0xd6   :  { %v132_v23 = vsel %vm45_vm8, %v409_v5, %v129_v21 }
  0xd7   :  { %305 = vcosq.f32 %v132_v23 }
  0xd8   :  { %307 = vsinq.f32 %v132_v23 }
  0xe1   :  { %v306_v28 = vpop.eup %305 }
  0xe2   :  { %v308_v29 = vpop.eup %307  ;;  %v143_v30 = vxor.u32 2147483648, %v306_v28 }
  0xe3   :  { %v140_v31 = vxor.u32 2147483648, %v308_v29 }
  0xe4   :  { %v144_v32 = vsel %vm142_vm9, %v143_v30, %v308_v29  ;;  %v248_v10 = vsel %vm246_vm10, %v143_v30, %v308_v29 }
  0xe5   :  { %v141_v33 = vsel %vm139_vm11, %v306_v28, %v140_v31  ;;  %v245_v34 = vsel %vm243_vm12, %v306_v28, %v140_v31 }
  0xe6   :  { %v145_v37 = vsel %vm138_vm13, %v141_v33, %v144_v32  ;;  %v249_v38 = vsel %vm242_vm14, %v245_v34, %v248_v10 }
  0xe7   :  { %v146_v39 = vsel %vm136_vm15, nan, %v145_v37  ;;  %v250_v40 = vsel %vm136_vm15, nan, %v249_v38 }
  0xe8   :  { %v254_v41 = vmul.f32 %v251_v35, %v146_v39  ;;  %v255_v42 = vmul.f32 %v253_v36, %v250_v40  ;;  %v258_v43 = vmul.f32 %v253_v36, %v146_v39  ;;  %v259_v44 = vmul.f32 %v251_v35, %v250_v40 }
  0xea   :  { %v256_v45 = vsub.f32 %v254_v41, %v255_v42  ;;  %v260_v46 = vadd.f32 %v259_v44, %v258_v43 }
  0xec   :  { %257 = vst [vmem:[#allocation5] sm:$0xf] %v256_v45  ;;  %262 = vst [vmem:[#allocation5 + $0x4] sm:$0xf] %v260_v46 }
  0xed   :  { %342 = shalt.err (!%p339_p12)
}
  0xee   :  { %s343_s5 = scalar_lea.hbm %s448_s3, 128 }
  0xef   :  { %p344_p13 = scmp.ne.s32.totalorder %s448_s3, %s343_s5  ;;  %p347_p0 = scmp.lt.u32.totalorder %s343_s5, %s448_s3 }
  0xf1   :  { %p349_p1 = pnand %p347_p0, %p344_p13 }
  0xf3   :  { %352 = shalt.err (!%p349_p1)
}
  0xf4   :  { %274 = dma.vmem_to_hbm [thread:$0]  %s269_s1, 128, %s448_s3, [#allocation4], %s358_s22, %s358_s22, %s359_s23  }
  0xf5   :  { %355 = dma.done.wait [#allocation4], 128  }
  0xf6   :  { %356 = vsyncadd [#allocation4], 4294967168 }
  0xf7   :  { %278 = vsyncpa [#allocation3], 1 }
  0xf8   :  { %279 = vsyncpa [#allocation4], 1 }

</bundles_post_ra>
